<compile_context>
chip_gen: v7x
topology: tpu7x:2x2x1
jax: 0.10.0
libtpu: 0.0.40
codegen_flags: <defaults>
</compile_context>

<pallas_src>
import functools
import math

import jax
import jax.numpy as jnp
from jax.experimental import pallas as pl
from jax.experimental.pallas import tpu as pltpu


# ----------------------------- in-kernel helpers -----------------------------

def _layernorm(x, gamma, beta, eps):
    x = x.astype(jnp.float32)
    mean = jnp.mean(x, axis=-1, keepdims=True)
    var = jnp.mean(jnp.square(x - mean), axis=-1, keepdims=True)
    inv = jax.lax.rsqrt(var + eps)
    return (x - mean) * inv * gamma.astype(jnp.float32) + beta.astype(jnp.float32)


def _gelu_tanh(x):
    c = math.sqrt(2.0 / math.pi)
    return 0.5 * x * (1.0 + jnp.tanh(c * (x + 0.044715 * x * x * x)))


def _dense(x, w_ref, b_ref):
    # x: [S, in]; w_ref: [out, in] (PyTorch layout, contracted in place — no
    # host transpose); b_ref: [1, out]. Returns f32 [S, out].
    w = w_ref[...]
    y = jax.lax.dot_general(
        x.astype(w.dtype), w,
        dimension_numbers=(((1,), (1,)), ((), ())),
        preferred_element_type=jnp.float32)
    return y + b_ref[...].astype(jnp.float32)


# ------------------------ kernel 1: attention sub-block -----------------------

def _attn_kernel(x_ref, mask_ref,
                 wq_ref, bq_ref, wk_ref, bk_ref, wv_ref, bv_ref,
                 wo_ref, bo_ref, g_ref, be_ref, o_ref,
                 *, num_heads, eps):
    x = x_ref[0]                                  # [S, H]
    S, H = x.shape
    hd = H // num_heads
    scale = 1.0 / math.sqrt(hd)

    q = _dense(x, wq_ref, bq_ref)                 # [S, H] f32
    k = _dense(x, wk_ref, bk_ref)
    v = _dense(x, wv_ref, bv_ref)

    amask = mask_ref[0].astype(jnp.float32)       # [1, S] additive key mask

    ctx_parts = []
    for h in range(num_heads):                    # static unroll over heads
        lo = h * hd
        qh = q[:, lo:lo + hd]
        kh = k[:, lo:lo + hd]
        vh = v[:, lo:lo + hd]
        s = jax.lax.dot_general(qh, kh, (((1,), (1,)), ((), ())),
                                preferred_element_type=jnp.float32) * scale
        s = s + amask                             # broadcast over query rows
        s = s - jnp.max(s, axis=-1, keepdims=True)
        e = jnp.exp(s)
        p = e / jnp.sum(e, axis=-1, keepdims=True)
        ctx_parts.append(
            jax.lax.dot_general(p, vh, (((1,), (0,)), ((), ())),
                                preferred_element_type=jnp.float32))
    ctx = jnp.concatenate(ctx_parts, axis=-1)     # [S, H] f32

    attn = _dense(ctx, wo_ref, bo_ref)            # BertSelfOutput dense
    y = _layernorm(attn + x.astype(jnp.float32), g_ref[...], be_ref[...], eps)
    o_ref[0] = y.astype(o_ref.dtype)


# --------------------- kernel 2: feed-forward sub-block -----------------------

def _ffn_kernel(a_ref, wi_ref, bi_ref, wo_ref, bo_ref, g_ref, be_ref,
                o_ref, acc_ref, *, eps):
    j = pl.program_id(1)

    @pl.when(j == 0)
    def _():
        acc_ref[...] = jnp.zeros_like(acc_ref)

    a = a_ref[0]                                  # [S, H]
    h = _gelu_tanh(_dense(a, wi_ref, bi_ref))     # [S, I_tile] f32
    wo = wo_ref[...]                              # [H, I_tile] (out, in-tile)
    acc_ref[...] += jax.lax.dot_general(
        h.astype(wo.dtype), wo,
        dimension_numbers=(((1,), (1,)), ((), ())),
        preferred_element_type=jnp.float32)

    @pl.when(j == pl.num_programs(1) - 1)
    def _():
        y = acc_ref[...] + bo_ref[...].astype(jnp.float32) + a.astype(jnp.float32)
        y = _layernorm(y, g_ref[...], be_ref[...], eps)
        o_ref[0] = y.astype(o_ref.dtype)


# ---------------------------------- wrapper -----------------------------------

def _pick_i_tile(intermediate_size):
    if intermediate_size <= 512:
        return intermediate_size
    for t in (512, 384, 256, 128):
        if intermediate_size % t == 0:
            return t
    return intermediate_size


def bert_layer(hidden_states, attention_mask, params, *, num_heads,
               layer_norm_eps=1e-12, compute_dtype=None, i_tile=None):
    """hidden_states: [B,S,H]; attention_mask: additive [B,S] or None.

    params: dict of PyTorch-layout tensors: wq/wk/wv/wo [H,H], wi [I,H],
    wo2 [H,I] (all (out,in)); biases bq/bk/bv/bo/bo2 [H], bi [I];
    LayerNorm ln1_g/ln1_b/ln2_g/ln2_b [H].
    """
    B, S, H = hidden_states.shape
    I = params["wi"].shape[0]
    assert H % num_heads == 0

    cast = (lambda t: t.astype(compute_dtype)) if compute_dtype is not None else (lambda t: t)
    x = cast(hidden_states)
    if attention_mask is None:
        attention_mask = jnp.zeros((B, S), dtype=jnp.float32)
    mask3 = attention_mask.reshape(B, 1, S).astype(jnp.float32)

    def row(v):  # bias / LN vectors as lane-major [1, N], kept in f32
        return v.reshape(1, -1).astype(jnp.float32)

    wq, wk, wv, wo = (cast(params[n]) for n in ("wq", "wk", "wv", "wo"))
    wi, wo2 = cast(params["wi"]), cast(params["wo2"])
    bq, bk, bv, bo = (row(params[n]) for n in ("bq", "bk", "bv", "bo"))
    bi, bo2 = row(params["bi"]), row(params["bo2"])
    g1, be1 = row(params["ln1_g"]), row(params["ln1_b"])
    g2, be2 = row(params["ln2_g"]), row(params["ln2_b"])

    out_dtype = hidden_states.dtype
    esize = jnp.dtype(x.dtype).itemsize

    # ---- self-attention + BertSelfOutput (residual + LayerNorm), grid over batch
    attn_cost = pl.CostEstimate(
        flops=8 * B * S * H * H + 4 * B * S * S * H,
        transcendentals=B * num_heads * S * S,
        bytes_accessed=2 * B * S * H * esize + 4 * H * H * esize + B * S * 4)
    full_hh = pl.BlockSpec((H, H), lambda b: (0, 0))   # weight stays VMEM-resident
    rowspec = pl.BlockSpec((1, H), lambda b: (0, 0))
    attn_out = pl.pallas_call(
        functools.partial(_attn_kernel, num_heads=num_heads, eps=layer_norm_eps),
        out_shape=jax.ShapeDtypeStruct((B, S, H), out_dtype),
        grid_spec=pltpu.PrefetchScalarGridSpec(
            num_scalar_prefetch=0,
            grid=(B,),
            in_specs=[
                pl.BlockSpec((1, S, H), lambda b: (b, 0, 0)),   # hidden_states
                pl.BlockSpec((1, 1, S), lambda b: (b, 0, 0)),   # additive mask
                full_hh, rowspec,   # wq, bq
                full_hh, rowspec,   # wk, bk
                full_hh, rowspec,   # wv, bv
                full_hh, rowspec,   # wo, bo
                rowspec, rowspec,   # ln1 gamma, beta
            ],
            out_specs=pl.BlockSpec((1, S, H), lambda b: (b, 0, 0)),
        ),
        compiler_params=pltpu.CompilerParams(
            dimension_semantics=("parallel",)),
        cost_estimate=attn_cost,
    )(x, mask3, wq, bq, wk, bk, wv, bv, wo, bo, g1, be1)

    # ---- intermediate GELU + BertOutput (residual + LayerNorm); tile the 4H dim
    if i_tile is None:
        i_tile = _pick_i_tile(I)
    assert I % i_tile == 0 and (i_tile == I or i_tile % 128 == 0)
    nj = I // i_tile

    ffn_cost = pl.CostEstimate(
        flops=4 * B * S * H * I,
        transcendentals=B * S * I,
        bytes_accessed=2 * B * S * H * esize + 2 * H * I * esize)

    ffn_out = pl.pallas_call(
        functools.partial(_ffn_kernel, eps=layer_norm_eps),
        out_shape=jax.ShapeDtypeStruct((B, S, H), out_dtype),
        grid_spec=pltpu.PrefetchScalarGridSpec(
            num_scalar_prefetch=0,
            grid=(B, nj),
            in_specs=[
                pl.BlockSpec((1, S, H), lambda b, j: (b, 0, 0)),     # attention_output
                pl.BlockSpec((i_tile, H), lambda b, j: (j, 0)),      # wi tile
                pl.BlockSpec((1, i_tile), lambda b, j: (0, j)),      # bi tile
                pl.BlockSpec((H, i_tile), lambda b, j: (0, j)),      # wo2 tile
                pl.BlockSpec((1, H), lambda b, j: (0, 0)),           # bo2
                pl.BlockSpec((1, H), lambda b, j: (0, 0)),           # ln2 gamma
                pl.BlockSpec((1, H), lambda b, j: (0, 0)),           # ln2 beta
            ],
            out_specs=pl.BlockSpec((1, S, H), lambda b, j: (b, 0, 0)),
            scratch_shapes=[pltpu.VMEM((S, H), jnp.float32)],        # FFN accumulator
        ),
        compiler_params=pltpu.CompilerParams(
            dimension_semantics=("parallel", "arbitrary")),
        cost_estimate=ffn_cost,
    )(attn_out, wi, bi, wo2, bo2, g2, be2)

    return ffn_out


# ----------------------------------- demo -------------------------------------

if __name__ == "__main__":
    key = jax.random.PRNGKey(0)
    B, S, H = 2, 8, 32
    num_heads = 4
    I = 4 * H
    eps = 1e-12

    keys = jax.random.split(key, 16)

    def w(k, shape, scale=0.02):
        return jax.random.normal(k, shape, dtype=jnp.float32) * scale

    hidden_states = jax.random.normal(keys[0], (B, S, H), dtype=jnp.float32)
    # Additive attention mask (0 = attend, -10000 = masked); mask the last key
    # position of batch element 1 to exercise the masking path.
    attention_mask = jnp.zeros((B, S), dtype=jnp.float32).at[1, S - 1].set(-10000.0)

    params = dict(
        wq=w(keys[1], (H, H)), bq=w(keys[2], (H,), 0.01),
        wk=w(keys[3], (H, H)), bk=w(keys[4], (H,), 0.01),
        wv=w(keys[5], (H, H)), bv=w(keys[6], (H,), 0.01),
        wo=w(keys[7], (H, H)), bo=w(keys[8], (H,), 0.01),
        ln1_g=jnp.ones((H,), jnp.float32), ln1_b=jnp.zeros((H,), jnp.float32),
        wi=w(keys[9], (I, H)), bi=w(keys[10], (I,), 0.01),
        wo2=w(keys[11], (H, I)), bo2=w(keys[12], (H,), 0.01),
        ln2_g=jnp.ones((H,), jnp.float32), ln2_b=jnp.zeros((H,), jnp.float32),
    )

    out = bert_layer(hidden_states, attention_mask, params,
                     num_heads=num_heads, layer_norm_eps=eps)
    out = jax.block_until_ready(out)

    # ---- pure-JAX reference (mirrors PyTorch BertLayer forward, eval mode) ----
    def ref_layer(x, mask, p):
        hd = H // num_heads

        def dense(t, wm, bv_):  # wm: (out, in)
            return jnp.einsum("...i,oi->...o", t, wm) + bv_

        def ln(t, g, b):
            mu = jnp.mean(t, -1, keepdims=True)
            var = jnp.mean((t - mu) ** 2, -1, keepdims=True)
            return (t - mu) * jax.lax.rsqrt(var + eps) * g + b

        q = dense(x, p["wq"], p["bq"]).reshape(B, S, num_heads, hd).transpose(0, 2, 1, 3)
        k = dense(x, p["wk"], p["bk"]).reshape(B, S, num_heads, hd).transpose(0, 2, 1, 3)
        v = dense(x, p["wv"], p["bv"]).reshape(B, S, num_heads, hd).transpose(0, 2, 1, 3)
        s = jnp.einsum("bhqd,bhkd->bhqk", q, k) / math.sqrt(hd)
        s = s + mask[:, None, None, :]
        a = jax.nn.softmax(s, axis=-1)
        ctx = jnp.einsum("bhqk,bhkd->bhqd", a, v).transpose(0, 2, 1, 3).reshape(B, S, H)
        attn = ln(dense(ctx, p["wo"], p["bo"]) + x, p["ln1_g"], p["ln1_b"])
        hmid = dense(attn, p["wi"], p["bi"])
        c = math.sqrt(2.0 / math.pi)
        hmid = 0.5 * hmid * (1.0 + jnp.tanh(c * (hmid + 0.044715 * hmid ** 3)))
        return ln(dense(hmid, p["wo2"], p["bo2"]) + attn, p["ln2_g"], p["ln2_b"])

    ref = ref_layer(hidden_states, attention_mask, params)
    assert out.shape == (B, S, H)
    err = float(jnp.max(jnp.abs(out - ref)))
    assert jnp.allclose(out, ref, atol=1e-4, rtol=1e-4), err

    print("KERNEL_OK")
</pallas_src>

<mosaic_0001>
module attributes {stable_mosaic.version = 11 : i64} {
  func.func @_attn_kernel(%arg0: i32, %arg1: memref<1x8x32xf32, #tpu.memory_space<vmem>>, %arg2: memref<1x1x8xf32, #tpu.memory_space<vmem>>, %arg3: memref<32x32xf32, #tpu.memory_space<vmem>>, %arg4: memref<1x32xf32, #tpu.memory_space<vmem>>, %arg5: memref<32x32xf32, #tpu.memory_space<vmem>>, %arg6: memref<1x32xf32, #tpu.memory_space<vmem>>, %arg7: memref<32x32xf32, #tpu.memory_space<vmem>>, %arg8: memref<1x32xf32, #tpu.memory_space<vmem>>, %arg9: memref<32x32xf32, #tpu.memory_space<vmem>>, %arg10: memref<1x32xf32, #tpu.memory_space<vmem>>, %arg11: memref<1x32xf32, #tpu.memory_space<vmem>>, %arg12: memref<1x32xf32, #tpu.memory_space<vmem>>, %arg13: memref<1x8x32xf32, #tpu.memory_space<vmem>>) attributes {dimension_semantics = [#tpu.dimension_semantics<parallel>], iteration_bounds = array<i64: 2>, scalar_prefetch = 0 : i64, scratch_operands = 0 : i64, tpu.core_type = #tpu.core_type<tc>, window_params = [{transform_indices = @transform_0, window_bounds = array<i64: 1, 8, 32>}, {transform_indices = @transform_1, window_bounds = array<i64: 1, 1, 8>}, {pipeline_mode = #tpu.pipeline_mode<synchronous>, transform_indices = @transform_2, window_bounds = array<i64: 32, 32>}, {pipeline_mode = #tpu.pipeline_mode<synchronous>, transform_indices = @transform_3, window_bounds = array<i64: 1, 32>}, {pipeline_mode = #tpu.pipeline_mode<synchronous>, transform_indices = @transform_4, window_bounds = array<i64: 32, 32>}, {pipeline_mode = #tpu.pipeline_mode<synchronous>, transform_indices = @transform_5, window_bounds = array<i64: 1, 32>}, {pipeline_mode = #tpu.pipeline_mode<synchronous>, transform_indices = @transform_6, window_bounds = array<i64: 32, 32>}, {pipeline_mode = #tpu.pipeline_mode<synchronous>, transform_indices = @transform_7, window_bounds = array<i64: 1, 32>}, {pipeline_mode = #tpu.pipeline_mode<synchronous>, transform_indices = @transform_8, window_bounds = array<i64: 32, 32>}, {pipeline_mode = #tpu.pipeline_mode<synchronous>, transform_indices = @transform_9, window_bounds = array<i64: 1, 32>}, {pipeline_mode = #tpu.pipeline_mode<synchronous>, transform_indices = @transform_10, window_bounds = array<i64: 1, 32>}, {pipeline_mode = #tpu.pipeline_mode<synchronous>, transform_indices = @transform_11, window_bounds = array<i64: 1, 32>}, {transform_indices = @transform_12, window_bounds = array<i64: 1, 8, 32>}]} {
    %c0 = arith.constant 0 : index
    %c0_0 = arith.constant 0 : index
    %c0_1 = arith.constant 0 : index
    %0 = vector.load %arg1[%c0, %c0_0, %c0_1] : memref<1x8x32xf32, #tpu.memory_space<vmem>>, vector<1x8x32xf32>
    %1 = vector.shape_cast %0 : vector<1x8x32xf32> to vector<8x32xf32>
    %c0_2 = arith.constant 0 : index
    %c0_3 = arith.constant 0 : index
    %2 = vector.load %arg3[%c0_2, %c0_3] : memref<32x32xf32, #tpu.memory_space<vmem>>, vector<32x32xf32>
    %cst = arith.constant dense<0.000000e+00> : vector<8x32xf32>
    %3 = tpu.matmul %1, %2, %cst {dimension_numbers = #tpu.dot_dimension_numbers<[1], [1], [0], [0], [0, 0, 1, 0], [], []>} : vector<8x32xf32>, vector<32x32xf32>, vector<8x32xf32> -> vector<8x32xf32>
    %c0_4 = arith.constant 0 : index
    %c0_5 = arith.constant 0 : index
    %4 = vector.load %arg4[%c0_4, %c0_5] : memref<1x32xf32, #tpu.memory_space<vmem>>, vector<1x32xf32>
    %5 = vector.broadcast %4 : vector<1x32xf32> to vector<8x32xf32>
    %6 = arith.addf %3, %5 : vector<8x32xf32>
    %c0_6 = arith.constant 0 : index
    %c0_7 = arith.constant 0 : index
    %7 = vector.load %arg5[%c0_6, %c0_7] : memref<32x32xf32, #tpu.memory_space<vmem>>, vector<32x32xf32>
    %cst_8 = arith.constant dense<0.000000e+00> : vector<8x32xf32>
    %8 = tpu.matmul %1, %7, %cst_8 {dimension_numbers = #tpu.dot_dimension_numbers<[1], [1], [0], [0], [0, 0, 1, 0], [], []>} : vector<8x32xf32>, vector<32x32xf32>, vector<8x32xf32> -> vector<8x32xf32>
    %c0_9 = arith.constant 0 : index
    %c0_10 = arith.constant 0 : index
    %9 = vector.load %arg6[%c0_9, %c0_10] : memref<1x32xf32, #tpu.memory_space<vmem>>, vector<1x32xf32>
    %10 = vector.broadcast %9 : vector<1x32xf32> to vector<8x32xf32>
    %11 = arith.addf %8, %10 : vector<8x32xf32>
    %c0_11 = arith.constant 0 : index
    %c0_12 = arith.constant 0 : index
    %12 = vector.load %arg7[%c0_11, %c0_12] : memref<32x32xf32, #tpu.memory_space<vmem>>, vector<32x32xf32>
    %cst_13 = arith.constant dense<0.000000e+00> : vector<8x32xf32>
    %13 = tpu.matmul %1, %12, %cst_13 {dimension_numbers = #tpu.dot_dimension_numbers<[1], [1], [0], [0], [0, 0, 1, 0], [], []>} : vector<8x32xf32>, vector<32x32xf32>, vector<8x32xf32> -> vector<8x32xf32>
    %c0_14 = arith.constant 0 : index
    %c0_15 = arith.constant 0 : index
    %14 = vector.load %arg8[%c0_14, %c0_15] : memref<1x32xf32, #tpu.memory_space<vmem>>, vector<1x32xf32>
    %15 = vector.broadcast %14 : vector<1x32xf32> to vector<8x32xf32>
    %16 = arith.addf %13, %15 : vector<8x32xf32>
    %c0_16 = arith.constant 0 : index
    %c0_17 = arith.constant 0 : index
    %c0_18 = arith.constant 0 : index
    %17 = vector.load %arg2[%c0_16, %c0_17, %c0_18] : memref<1x1x8xf32, #tpu.memory_space<vmem>>, vector<1x1x8xf32>
    %18 = vector.shape_cast %17 : vector<1x1x8xf32> to vector<1x8xf32>
    %19 = vector.extract_strided_slice %6 {offsets = [0, 0], sizes = [8, 8], strides = [1, 1]} : vector<8x32xf32> to vector<8x8xf32>
    %20 = vector.extract_strided_slice %11 {offsets = [0, 0], sizes = [8, 8], strides = [1, 1]} : vector<8x32xf32> to vector<8x8xf32>
    %21 = vector.extract_strided_slice %16 {offsets = [0, 0], sizes = [8, 8], strides = [1, 1]} : vector<8x32xf32> to vector<8x8xf32>
    %cst_19 = arith.constant dense<0.000000e+00> : vector<8x8xf32>
    %22 = tpu.matmul %19, %20, %cst_19 {dimension_numbers = #tpu.dot_dimension_numbers<[1], [1], [0], [0], [0, 0, 1, 0], [], []>} : vector<8x8xf32>, vector<8x8xf32>, vector<8x8xf32> -> vector<8x8xf32>
    %cst_20 = arith.constant 0.353553385 : f32
    %23 = vector.broadcast %cst_20 : f32 to vector<8x8xf32>
    %24 = arith.mulf %22, %23 : vector<8x8xf32>
    %25 = vector.broadcast %18 : vector<1x8xf32> to vector<8x8xf32>
    %26 = arith.addf %24, %25 : vector<8x8xf32>
    %cst_21 = arith.constant dense<0xFF800000> : vector<8xf32>
    %27 = vector.multi_reduction <maximumf>, %26, %cst_21 [1] : vector<8x8xf32> to vector<8xf32>
    %28 = vector.shape_cast %27 : vector<8xf32> to vector<8x1xf32>
    %29 = vector.broadcast %28 : vector<8x1xf32> to vector<8x8xf32>
    %30 = arith.subf %26, %29 : vector<8x8xf32>
    %31 = math.exp %30 : vector<8x8xf32>
    %cst_22 = arith.constant dense<0.000000e+00> : vector<8xf32>
    %32 = vector.multi_reduction <add>, %31, %cst_22 [1] : vector<8x8xf32> to vector<8xf32>
    %33 = vector.shape_cast %32 : vector<8xf32> to vector<8x1xf32>
    %34 = vector.broadcast %33 : vector<8x1xf32> to vector<8x8xf32>
    %35 = arith.divf %31, %34 : vector<8x8xf32>
    %cst_23 = arith.constant dense<0.000000e+00> : vector<8x8xf32>
    %36 = tpu.matmul %35, %21, %cst_23 {dimension_numbers = #tpu.dot_dimension_numbers<[1], [0], [0], [1], [0, 0, 1, 1], [], []>} : vector<8x8xf32>, vector<8x8xf32>, vector<8x8xf32> -> vector<8x8xf32>
    %37 = vector.extract_strided_slice %6 {offsets = [0, 8], sizes = [8, 8], strides = [1, 1]} : vector<8x32xf32> to vector<8x8xf32>
    %38 = vector.extract_strided_slice %11 {offsets = [0, 8], sizes = [8, 8], strides = [1, 1]} : vector<8x32xf32> to vector<8x8xf32>
    %39 = vector.extract_strided_slice %16 {offsets = [0, 8], sizes = [8, 8], strides = [1, 1]} : vector<8x32xf32> to vector<8x8xf32>
    %cst_24 = arith.constant dense<0.000000e+00> : vector<8x8xf32>
    %40 = tpu.matmul %37, %38, %cst_24 {dimension_numbers = #tpu.dot_dimension_numbers<[1], [1], [0], [0], [0, 0, 1, 0], [], []>} : vector<8x8xf32>, vector<8x8xf32>, vector<8x8xf32> -> vector<8x8xf32>
    %cst_25 = arith.constant 0.353553385 : f32
    %41 = vector.broadcast %cst_25 : f32 to vector<8x8xf32>
    %42 = arith.mulf %40, %41 : vector<8x8xf32>
    %43 = vector.broadcast %18 : vector<1x8xf32> to vector<8x8xf32>
    %44 = arith.addf %42, %43 : vector<8x8xf32>
    %cst_26 = arith.constant dense<0xFF800000> : vector<8xf32>
    %45 = vector.multi_reduction <maximumf>, %44, %cst_26 [1] : vector<8x8xf32> to vector<8xf32>
    %46 = vector.shape_cast %45 : vector<8xf32> to vector<8x1xf32>
    %47 = vector.broadcast %46 : vector<8x1xf32> to vector<8x8xf32>
    %48 = arith.subf %44, %47 : vector<8x8xf32>
    %49 = math.exp %48 : vector<8x8xf32>
    %cst_27 = arith.constant dense<0.000000e+00> : vector<8xf32>
    %50 = vector.multi_reduction <add>, %49, %cst_27 [1] : vector<8x8xf32> to vector<8xf32>
    %51 = vector.shape_cast %50 : vector<8xf32> to vector<8x1xf32>
    %52 = vector.broadcast %51 : vector<8x1xf32> to vector<8x8xf32>
    %53 = arith.divf %49, %52 : vector<8x8xf32>
    %cst_28 = arith.constant dense<0.000000e+00> : vector<8x8xf32>
    %54 = tpu.matmul %53, %39, %cst_28 {dimension_numbers = #tpu.dot_dimension_numbers<[1], [0], [0], [1], [0, 0, 1, 1], [], []>} : vector<8x8xf32>, vector<8x8xf32>, vector<8x8xf32> -> vector<8x8xf32>
    %55 = vector.extract_strided_slice %6 {offsets = [0, 16], sizes = [8, 8], strides = [1, 1]} : vector<8x32xf32> to vector<8x8xf32>
    %56 = vector.extract_strided_slice %11 {offsets = [0, 16], sizes = [8, 8], strides = [1, 1]} : vector<8x32xf32> to vector<8x8xf32>
    %57 = vector.extract_strided_slice %16 {offsets = [0, 16], sizes = [8, 8], strides = [1, 1]} : vector<8x32xf32> to vector<8x8xf32>
    %cst_29 = arith.constant dense<0.000000e+00> : vector<8x8xf32>
    %58 = tpu.matmul %55, %56, %cst_29 {dimension_numbers = #tpu.dot_dimension_numbers<[1], [1], [0], [0], [0, 0, 1, 0], [], []>} : vector<8x8xf32>, vector<8x8xf32>, vector<8x8xf32> -> vector<8x8xf32>
    %cst_30 = arith.constant 0.353553385 : f32
    %59 = vector.broadcast %cst_30 : f32 to vector<8x8xf32>
    %60 = arith.mulf %58, %59 : vector<8x8xf32>
    %61 = vector.broadcast %18 : vector<1x8xf32> to vector<8x8xf32>
    %62 = arith.addf %60, %61 : vector<8x8xf32>
    %cst_31 = arith.constant dense<0xFF800000> : vector<8xf32>
    %63 = vector.multi_reduction <maximumf>, %62, %cst_31 [1] : vector<8x8xf32> to vector<8xf32>
    %64 = vector.shape_cast %63 : vector<8xf32> to vector<8x1xf32>
    %65 = vector.broadcast %64 : vector<8x1xf32> to vector<8x8xf32>
    %66 = arith.subf %62, %65 : vector<8x8xf32>
    %67 = math.exp %66 : vector<8x8xf32>
    %cst_32 = arith.constant dense<0.000000e+00> : vector<8xf32>
    %68 = vector.multi_reduction <add>, %67, %cst_32 [1] : vector<8x8xf32> to vector<8xf32>
    %69 = vector.shape_cast %68 : vector<8xf32> to vector<8x1xf32>
    %70 = vector.broadcast %69 : vector<8x1xf32> to vector<8x8xf32>
    %71 = arith.divf %67, %70 : vector<8x8xf32>
    %cst_33 = arith.constant dense<0.000000e+00> : vector<8x8xf32>
    %72 = tpu.matmul %71, %57, %cst_33 {dimension_numbers = #tpu.dot_dimension_numbers<[1], [0], [0], [1], [0, 0, 1, 1], [], []>} : vector<8x8xf32>, vector<8x8xf32>, vector<8x8xf32> -> vector<8x8xf32>
    %73 = vector.extract_strided_slice %6 {offsets = [0, 24], sizes = [8, 8], strides = [1, 1]} : vector<8x32xf32> to vector<8x8xf32>
    %74 = vector.extract_strided_slice %11 {offsets = [0, 24], sizes = [8, 8], strides = [1, 1]} : vector<8x32xf32> to vector<8x8xf32>
    %75 = vector.extract_strided_slice %16 {offsets = [0, 24], sizes = [8, 8], strides = [1, 1]} : vector<8x32xf32> to vector<8x8xf32>
    %cst_34 = arith.constant dense<0.000000e+00> : vector<8x8xf32>
    %76 = tpu.matmul %73, %74, %cst_34 {dimension_numbers = #tpu.dot_dimension_numbers<[1], [1], [0], [0], [0, 0, 1, 0], [], []>} : vector<8x8xf32>, vector<8x8xf32>, vector<8x8xf32> -> vector<8x8xf32>
    %cst_35 = arith.constant 0.353553385 : f32
    %77 = vector.broadcast %cst_35 : f32 to vector<8x8xf32>
    %78 = arith.mulf %76, %77 : vector<8x8xf32>
    %79 = vector.broadcast %18 : vector<1x8xf32> to vector<8x8xf32>
    %80 = arith.addf %78, %79 : vector<8x8xf32>
    %cst_36 = arith.constant dense<0xFF800000> : vector<8xf32>
    %81 = vector.multi_reduction <maximumf>, %80, %cst_36 [1] : vector<8x8xf32> to vector<8xf32>
    %82 = vector.shape_cast %81 : vector<8xf32> to vector<8x1xf32>
    %83 = vector.broadcast %82 : vector<8x1xf32> to vector<8x8xf32>
    %84 = arith.subf %80, %83 : vector<8x8xf32>
    %85 = math.exp %84 : vector<8x8xf32>
    %cst_37 = arith.constant dense<0.000000e+00> : vector<8xf32>
    %86 = vector.multi_reduction <add>, %85, %cst_37 [1] : vector<8x8xf32> to vector<8xf32>
    %87 = vector.shape_cast %86 : vector<8xf32> to vector<8x1xf32>
    %88 = vector.broadcast %87 : vector<8x1xf32> to vector<8x8xf32>
    %89 = arith.divf %85, %88 : vector<8x8xf32>
    %cst_38 = arith.constant dense<0.000000e+00> : vector<8x8xf32>
    %90 = tpu.matmul %89, %75, %cst_38 {dimension_numbers = #tpu.dot_dimension_numbers<[1], [0], [0], [1], [0, 0, 1, 1], [], []>} : vector<8x8xf32>, vector<8x8xf32>, vector<8x8xf32> -> vector<8x8xf32>
    %91 = tpu.concatenate %36, %54, %72, %90 in 1 : vector<8x8xf32>, vector<8x8xf32>, vector<8x8xf32>, vector<8x8xf32> -> vector<8x32xf32>
    %c0_39 = arith.constant 0 : index
    %c0_40 = arith.constant 0 : index
    %92 = vector.load %arg9[%c0_39, %c0_40] : memref<32x32xf32, #tpu.memory_space<vmem>>, vector<32x32xf32>
    %cst_41 = arith.constant dense<0.000000e+00> : vector<8x32xf32>
    %93 = tpu.matmul %91, %92, %cst_41 {dimension_numbers = #tpu.dot_dimension_numbers<[1], [1], [0], [0], [0, 0, 1, 0], [], []>} : vector<8x32xf32>, vector<32x32xf32>, vector<8x32xf32> -> vector<8x32xf32>
    %c0_42 = arith.constant 0 : index
    %c0_43 = arith.constant 0 : index
    %94 = vector.load %arg10[%c0_42, %c0_43] : memref<1x32xf32, #tpu.memory_space<vmem>>, vector<1x32xf32>
    %95 = vector.broadcast %94 : vector<1x32xf32> to vector<8x32xf32>
    %96 = arith.addf %93, %95 : vector<8x32xf32>
    %97 = arith.addf %96, %1 : vector<8x32xf32>
    %c0_44 = arith.constant 0 : index
    %c0_45 = arith.constant 0 : index
    %98 = vector.load %arg11[%c0_44, %c0_45] : memref<1x32xf32, #tpu.memory_space<vmem>>, vector<1x32xf32>
    %c0_46 = arith.constant 0 : index
    %c0_47 = arith.constant 0 : index
    %99 = vector.load %arg12[%c0_46, %c0_47] : memref<1x32xf32, #tpu.memory_space<vmem>>, vector<1x32xf32>
    %cst_48 = arith.constant dense<0.000000e+00> : vector<8xf32>
    %100 = vector.multi_reduction <add>, %97, %cst_48 [1] : vector<8x32xf32> to vector<8xf32>
    %101 = vector.shape_cast %100 : vector<8xf32> to vector<8x1xf32>
    %cst_49 = arith.constant 3.200000e+01 : f32
    %102 = vector.broadcast %cst_49 : f32 to vector<8x1xf32>
    %103 = arith.divf %101, %102 : vector<8x1xf32>
    %104 = vector.broadcast %103 : vector<8x1xf32> to vector<8x32xf32>
    %105 = arith.subf %97, %104 : vector<8x32xf32>
    %106 = arith.mulf %105, %105 : vector<8x32xf32>
    %cst_50 = arith.constant dense<0.000000e+00> : vector<8xf32>
    %107 = vector.multi_reduction <add>, %106, %cst_50 [1] : vector<8x32xf32> to vector<8xf32>
    %108 = vector.shape_cast %107 : vector<8xf32> to vector<8x1xf32>
    %cst_51 = arith.constant 3.200000e+01 : f32
    %109 = vector.broadcast %cst_51 : f32 to vector<8x1xf32>
    %110 = arith.divf %108, %109 : vector<8x1xf32>
    %cst_52 = arith.constant 9.99999996E-13 : f32
    %111 = vector.broadcast %cst_52 : f32 to vector<8x1xf32>
    %112 = arith.addf %110, %111 : vector<8x1xf32>
    %113 = math.rsqrt %112 : vector<8x1xf32>
    %114 = vector.broadcast %103 : vector<8x1xf32> to vector<8x32xf32>
    %115 = arith.subf %97, %114 : vector<8x32xf32>
    %116 = vector.broadcast %113 : vector<8x1xf32> to vector<8x32xf32>
    %117 = arith.mulf %115, %116 : vector<8x32xf32>
    %118 = vector.broadcast %98 : vector<1x32xf32> to vector<8x32xf32>
    %119 = arith.mulf %117, %118 : vector<8x32xf32>
    %120 = vector.broadcast %99 : vector<1x32xf32> to vector<8x32xf32>
    %121 = arith.addf %119, %120 : vector<8x32xf32>
    %c0_53 = arith.constant 0 : index
    %c0_54 = arith.constant 0 : index
    %c0_55 = arith.constant 0 : index
    %122 = vector.load %arg13[%c0_53, %c0_54, %c0_55] : memref<1x8x32xf32, #tpu.memory_space<vmem>>, vector<1x8x32xf32>
    %123 = vector.shape_cast %122 : vector<1x8x32xf32> to vector<8x32xf32>
    %124 = vector.shape_cast %121 : vector<8x32xf32> to vector<1x8x32xf32>
    tpu.vector_store %arg13[%c0_53, %c0_54, %c0_55], %124 {strides = array<i32>} : memref<1x8x32xf32, #tpu.memory_space<vmem>>, vector<1x8x32xf32>,
    return
  }
  func.func @transform_0(%arg0: i32) -> (i32, i32, i32) {
    %c0_i32 = arith.constant 0 : i32
    %c0_i32_0 = arith.constant 0 : i32
    %c0_i32_1 = arith.constant 0 : i32
    return %arg0, %c0_i32, %c0_i32_0 : i32, i32, i32
  }
  func.func @transform_1(%arg0: i32) -> (i32, i32, i32) {
    %c0_i32 = arith.constant 0 : i32
    %c0_i32_0 = arith.constant 0 : i32
    %c0_i32_1 = arith.constant 0 : i32
    return %arg0, %c0_i32, %c0_i32_0 : i32, i32, i32
  }
  func.func @transform_2(%arg0: i32) -> (i32, i32) {
    %c0_i32 = arith.constant 0 : i32
    %c0_i32_0 = arith.constant 0 : i32
    %c0_i32_1 = arith.constant 0 : i32
    return %c0_i32, %c0_i32_0 : i32, i32
  }
  func.func @transform_3(%arg0: i32) -> (i32, i32) {
    %c0_i32 = arith.constant 0 : i32
    %c0_i32_0 = arith.constant 0 : i32
    %c0_i32_1 = arith.constant 0 : i32
    return %c0_i32, %c0_i32_0 : i32, i32
  }
  func.func @transform_4(%arg0: i32) -> (i32, i32) {
    %c0_i32 = arith.constant 0 : i32
    %c0_i32_0 = arith.constant 0 : i32
    %c0_i32_1 = arith.constant 0 : i32
    return %c0_i32, %c0_i32_0 : i32, i32
  }
  func.func @transform_5(%arg0: i32) -> (i32, i32) {
    %c0_i32 = arith.constant 0 : i32
    %c0_i32_0 = arith.constant 0 : i32
    %c0_i32_1 = arith.constant 0 : i32
    return %c0_i32, %c0_i32_0 : i32, i32
  }
  func.func @transform_6(%arg0: i32) -> (i32, i32) {
    %c0_i32 = arith.constant 0 : i32
    %c0_i32_0 = arith.constant 0 : i32
    %c0_i32_1 = arith.constant 0 : i32
    return %c0_i32, %c0_i32_0 : i32, i32
  }
  func.func @transform_7(%arg0: i32) -> (i32, i32) {
    %c0_i32 = arith.constant 0 : i32
    %c0_i32_0 = arith.constant 0 : i32
    %c0_i32_1 = arith.constant 0 : i32
    return %c0_i32, %c0_i32_0 : i32, i32
  }
  func.func @transform_8(%arg0: i32) -> (i32, i32) {
    %c0_i32 = arith.constant 0 : i32
    %c0_i32_0 = arith.constant 0 : i32
    %c0_i32_1 = arith.constant 0 : i32
    return %c0_i32, %c0_i32_0 : i32, i32
  }
  func.func @transform_9(%arg0: i32) -> (i32, i32) {
    %c0_i32 = arith.constant 0 : i32
    %c0_i32_0 = arith.constant 0 : i32
    %c0_i32_1 = arith.constant 0 : i32
    return %c0_i32, %c0_i32_0 : i32, i32
  }
  func.func @transform_10(%arg0: i32) -> (i32, i32) {
    %c0_i32 = arith.constant 0 : i32
    %c0_i32_0 = arith.constant 0 : i32
    %c0_i32_1 = arith.constant 0 : i32
    return %c0_i32, %c0_i32_0 : i32, i32
  }
  func.func @transform_11(%arg0: i32) -> (i32, i32) {
    %c0_i32 = arith.constant 0 : i32
    %c0_i32_0 = arith.constant 0 : i32
    %c0_i32_1 = arith.constant 0 : i32
    return %c0_i32, %c0_i32_0 : i32, i32
  }
  func.func @transform_12(%arg0: i32) -> (i32, i32, i32) {
    %c0_i32 = arith.constant 0 : i32
    %c0_i32_0 = arith.constant 0 : i32
    %c0_i32_1 = arith.constant 0 : i32
    return %arg0, %c0_i32, %c0_i32_0 : i32, i32, i32
  }
}

</mosaic_0001>

<bundles_post_ra>
// kernel: tpu_custom_call.1
= control target key start
LH: loop header
LB: loop body
LE: loop exit
PB: predicated region body
PF: predicated region fallthrough
CT: control target
= control target key end

     0   :  { %s2811_s0 = inlined_call_operand.hbm [shape: f32[2,8,32], index: 0, kind: input, shape index: {}]   ;;  %s2812_s1 = inlined_call_operand.vmem [shape: f32[2,1,8], index: 1, kind: input, shape index: {}]   ;;  %s2813_s2 = inlined_call_operand.hbm [shape: f32[32,32], index: 2, kind: input, shape index: {}]   ;;  %s2814_s3 = inlined_call_operand.vmem [shape: f32[1,32], index: 3, kind: input, shape index: {}]   ;;  %s2815_s4 = inlined_call_operand.hbm [shape: f32[32,32], index: 4, kind: input, shape index: {}]   ;;  %s2816_s5 = inlined_call_operand.vmem [shape: f32[1,32], index: 5, kind: input, shape index: {}]   ;;  %s2817_s6 = inlined_call_operand.hbm [shape: f32[32,32], index: 6, kind: input, shape index: {}]   ;;  %s2818_s7 = inlined_call_operand.vmem [shape: f32[1,32], index: 7, kind: input, shape index: {}]   ;;  %s2819_s8 = inlined_call_operand.hbm [shape: f32[32,32], index: 8, kind: input, shape index: {}]   ;;  %s2820_s9 = inlined_call_operand.vmem [shape: f32[1,32], index: 9, kind: input, shape index: {}]   ;;  %s2821_s10 = inlined_call_operand.vmem [shape: f32[1,32], index: 10, kind: input, shape index: {}]   ;;  %s2822_s11 = inlined_call_operand.vmem [shape: f32[1,32], index: 11, kind: input, shape index: {}]   ;;  %s2823_s12 = inlined_call_operand.hbm [shape: f32[2,8,32], index: 12, kind: output, shape index: {}]  }
   0x1   :  { %2828 = sst [smem:[#allocation16_spill]] %s2811_s0 }
   0x2   :  { %2829 = sst [smem:[#allocation17_spill]] %s2813_s2 }
   0x3   :  { %2830 = sst [smem:[#allocation18_spill]] %s2820_s9 }
   0x4   :  { %2831 = sst [smem:[#allocation19_spill]] %s2821_s10 }
   0x5   :  { %2832 = sst [smem:[#allocation20_spill]] %s2822_s11 }
   0x6   :  { %2833 = sst [smem:[#allocation21_spill]] %s2823_s12 }
   0x7   :  { %17 = vsyncpa [#allocation3], 0 }
   0x8   :  { %19 = vsyncpa [#allocation3 + $0x1], 0 }
   0x9   :  { %20 = vsyncpa [#allocation6], 0 }
   0xa   :  { %21 = vsyncpa [#allocation9], 0 }
   0xb   :  { %22 = vsyncpa [#allocation4], 0 }
   0xc   :  { %24 = vsyncpa [#allocation4 + $0x1], 0  ;;  %s2360_s21 = smov 0   ;;  %s2362_s22 = smov 0  }
   0xd   :  { %s2364_s23 = smov 0   ;;  %s2366_s24 = smov 0  }
   0xe LB: > { %s2278_s25 = smov [#allocation5]   ;;  %s2381_s27 = sadd.s32 4294967295, %s2276_s24   ;;  %s2276_s24 = sphi %s2366_s24, %s2862_s24   ;;  %s2272_s23 = sphi %s2364_s23, %s2861_s23   ;;  %s2268_s22 = sphi %s2362_s22, %s2860_s22   ;;  %s2264_s21 = sphi %s2360_s21, %s2859_s21  }
   0xf   : > { %s335_s26 = sshll.u32 %s2278_s25, 4  ;;  %p1734_p0 = scmp.ge.s32.totalorder %s2276_s24, 1  ;;  %s2386_s26 = int_to_ptr.vmem [resolvable:$true] %s335_s26 }
  0x10   : > { %p2825_p1 = scmp.eq.s32.totalorder %s2381_s27, 0  ;;  %p323_p2 = scmp.lt.s32.totalorder %s2276_s24, 3 }
  0x11   : > { %s2279_s29 = smov [#allocation8]   ;;  %s2280_s14 = smov [#allocation7]  }
  0x12   : > { %p2388_p3 = pnand %p1734_p0, %p323_p2  ;;  %s367_s30 = sshll.u32 %s2279_s29, 4  ;;  %s2401_s30 = int_to_ptr.vmem [resolvable:$true] %s367_s30 }
  0x13   : > { %s351_s15 = sshll.u32 %s2280_s14, 4  ;;  %s2836_s2 = sld [smem:[#allocation17_spill]]  ;;  %s2403_s15 = int_to_ptr.vmem [resolvable:$true] %s351_s15 }
  0x14   : > { %s2834_s28 = scalar_select %p2388_p3, 1, 0 }
  0x15   : > { %p1964_p5 = pneg %p2388_p3 }
  0x17   : > { %p2397_p6 = pnand %p1964_p5, %p2825_p1 }
  0x19   : > { %s2060_s18 = scalar_lea.hbm %s2836_s2, 512  ;;  %p2413_p8 = pneg %p2397_p6 }
  0x1a   : > { %p2061_p7 = scmp.ne.s32.totalorder %s2836_s2, %s2060_s18  ;;  %p2067_p11 = scmp.lt.u32.totalorder %s2060_s18, %s2836_s2 }
  0x1c   : > { %p2063_p9 = pnand %p2413_p8, %p2061_p7 }
  0x1e   : > { %p2064_p10 = pneg %p2063_p9 }
  0x20   : > { %p2069_p12 = pnand %p2067_p11, %p2064_p10 }
  0x22   : > { %2072 = shalt.err (!%p2069_p12)
}
  0x23   : > { %s2073_s16 = scalar_lea.vmem %s2386_s26, 512  ;;  %p2081_p5 = scmp.lt.s32.totalorder %s2386_s26, %s2386_s26 }
  0x24   : > { %p2074_p13 = scmp.ne.s32.totalorder %s2386_s26, %s2073_s16  ;;  %p2082_p4 = scmp.lt.s32.totalorder %s2073_s16, %s2073_s16 }
  0x26   : > { %p2076_p0 = pnand %p2074_p13, %p2413_p8  ;;  %p2083_p7 = por %p2082_p4, %p2081_p5 }
  0x28   : > { %p2077_p2 = pneg %p2076_p0 }
  0x2a   : > { %p2084_p9 = pnand %p2083_p7, %p2077_p2 }
  0x2c   : > { %2087 = shalt.err (!%p2084_p9)
}
  0x2d   : > { %s2281_s17 = smov 128   ;;  %s2282_s18 = smov 8  }
  0x2e   : > { %1967 = dma.hbm_to_vmem [thread:$0]  (!%p2397_p6), %s2836_s2, 512, %s2386_s26, [#allocation6], %s2281_s17, %s2281_s17, %s2282_s18  }
  0x2f   : > { %s2088_s16 = scalar_lea.hbm %s2817_s6, 512 }
  0x30   : > { %p2089_p4 = scmp.ne.s32.totalorder %s2817_s6, %s2088_s16  ;;  %p2095_p12 = scmp.lt.u32.totalorder %s2088_s16, %s2817_s6 }
  0x32   : > { %p2091_p10 = pnand %p2089_p4, %p2413_p8 }
  0x34   : > { %p2092_p11 = pneg %p2091_p10 }
  0x36   : > { %p2097_p13 = pnand %p2095_p12, %p2092_p11 }
  0x38   : > { %2100 = shalt.err (!%p2097_p13)
}
  0x39   : > { %s2101_s26 = scalar_lea.vmem %s2401_s30, 512  ;;  %p2109_p7 = scmp.lt.s32.totalorder %s2401_s30, %s2401_s30 }
  0x3a   : > { %p2102_p0 = scmp.ne.s32.totalorder %s2401_s30, %s2101_s26  ;;  %p2110_p9 = scmp.lt.s32.totalorder %s2101_s26, %s2101_s26 }
  0x3c   : > { %p2104_p2 = pnand %p2102_p0, %p2413_p8  ;;  %p2111_p4 = por %p2110_p9, %p2109_p7 }
  0x3e   : > { %p2105_p5 = pneg %p2104_p2 }
  0x40   : > { %p2112_p10 = pnand %p2111_p4, %p2105_p5 }
  0x42   : > { %2115 = shalt.err (!%p2112_p10)
}
  0x43   : > { %1973 = dma.hbm_to_vmem [thread:$0]  (!%p2397_p6), %s2817_s6, 512, %s2401_s30, [#allocation9], %s2281_s17, %s2281_s17, %s2282_s18  }
  0x44   : > { %s2116_s19 = scalar_lea.hbm %s2815_s4, 512 }
  0x45   : > { %p2117_p11 = scmp.ne.s32.totalorder %s2815_s4, %s2116_s19  ;;  %p2123_p0 = scmp.lt.u32.totalorder %s2116_s19, %s2815_s4 }
  0x47   : > { %p2119_p12 = pnand %p2117_p11, %p2413_p8 }
  0x49   : > { %p2120_p13 = pneg %p2119_p12 }
  0x4b   : > { %p2125_p2 = pnand %p2123_p0, %p2120_p13 }
  0x4d   : > { %2128 = shalt.err (!%p2125_p2)
}
  0x4e   : > { %s2129_s30 = scalar_lea.vmem %s2403_s15, 512  ;;  %p2137_p4 = scmp.lt.s32.totalorder %s2403_s15, %s2403_s15 }
  0x4f   : > { %p2130_p5 = scmp.ne.s32.totalorder %s2403_s15, %s2129_s30  ;;  %p2138_p10 = scmp.lt.s32.totalorder %s2129_s30, %s2129_s30 }
  0x51   : > { %p2132_p7 = pnand %p2130_p5, %p2413_p8  ;;  %p2139_p11 = por %p2138_p10, %p2137_p4 }
  0x53   : > { %p2133_p9 = pneg %p2132_p7 }
  0x55   : > { %p2140_p12 = pnand %p2139_p11, %p2133_p9 }
  0x57   : > { %2143 = shalt.err (!%p2140_p12)
}
  0x58   : > { %1970 = dma.hbm_to_vmem [thread:$0]  (!%p2397_p6), %s2815_s4, 512, %s2403_s15, [#allocation6], %s2281_s17, %s2281_s17, %s2282_s18  }
  0x59   : > { %s2283_s10 = smov [#allocation10]   ;;  %s2144_s20 = scalar_lea.hbm %s2819_s8, 512 }
  0x5a   : > { %s383_s11 = sshll.u32 %s2283_s10, 4  ;;  %p2145_p13 = scmp.ne.s32.totalorder %s2819_s8, %s2144_s20  ;;  %s384_s11 = int_to_ptr.vmem [resolvable:$true] %s383_s11 }
  0x5b   : > { %p2151_p5 = scmp.lt.u32.totalorder %s2144_s20, %s2819_s8 }
  0x5c   : > { %p2147_p0 = pnand %p2145_p13, %p2413_p8 }
  0x5e   : > { %p2148_p2 = pneg %p2147_p0 }
  0x60   : > { %p2153_p7 = pnand %p2151_p5, %p2148_p2 }
  0x62   : > { %2156 = shalt.err (!%p2153_p7)
}
  0x63   : > { %s2157_s15 = scalar_lea.vmem %s384_s11, 512  ;;  %p2165_p11 = scmp.lt.s32.totalorder %s384_s11, %s384_s11 }
  0x64   : > { %p2158_p9 = scmp.ne.s32.totalorder %s384_s11, %s2157_s15  ;;  %p2166_p12 = scmp.lt.s32.totalorder %s2157_s15, %s2157_s15 }
  0x66   : > { %p2160_p4 = pnand %p2158_p9, %p2413_p8  ;;  %p2167_p1 = por %p2166_p12, %p2165_p11 }
  0x68   : > { %p2161_p10 = pneg %p2160_p4 }
  0x6a   : > { %p2168_p3 = pnand %p2167_p1, %p2161_p10 }
  0x6c   : > { %2171 = shalt.err (!%p2168_p3)
}
  0x6d   : > { %1976 = dma.hbm_to_vmem [thread:$0]  (!%p2397_p6), %s2819_s8, 512, %s384_s11, [#allocation9], %s2281_s17, %s2281_s17, %s2282_s18  }
  0x6e   : > { %s1733_s13 = sadd.s32 4294967294, %s2276_s24   ;;  %s2512_s25 = sadd.s32 1, %s2276_s24  }
  0x6f   : > { %s34_s10 = ssub.s32 %s2276_s24, %s2512_s25  ;;  %s37_s12 = sadd.s32 1, %s2272_s23 }
  0x70   : > { %p35_p1 = scmp.eq.s32.totalorder %s34_s10, 0  ;;  %p44_p3 = scmp.ne.s32.totalorder %s2272_s23, %s2268_s22 }
  0x71   : > { %p45_p8 = scmp.eq.s32.totalorder %s2276_s24, 0  ;;  %p50_p13 = scmp.ne.s32.totalorder %s2268_s22, %s2264_s21 }
  0x72   : > { %s2523_s19 = scalar_select %p35_p1, %s2272_s23, %s37_s12  }
  0x73   : > { %p2525_p0 = por %p45_p8, %p44_p3  ;;  %p2839_p2 = scmp.eq.s32.totalorder %s2381_s27, 0 }
  0x74   : > { %p310_p5 = scmp.eq.s32.totalorder %s2381_s27, 1  ;;  %p316_p7 = scmp.eq.s32.totalorder %s1733_s13, 1 }
  0x75   : > { %p2531_p6 = por %p2839_p2, %p50_p13  ;;  %p1989_p9 = scmp.lt.s32.totalorder %s2276_s24, 2 }
  0x76   : > { %s406_s18 = sand.u32 1, %s2272_s23   ;;  %p2538_p4 = por %p310_p5, %p44_p3 }
  0x77   : > { %p2542_p10 = por %p316_p7, %p50_p13  ;;  %s1740_s14 = sshll.u32 %s406_s18, 3 }
  0x78   : > { %s2841_s11 = scalar_select %p2538_p4, 1, 0 }
  0x79   : > { %s2842_s29 = scalar_select %p2542_p10, 1, 0 }
  0x7a   : > { %s1741_s16 = sshll.u32 %s2276_s24, 7  ;;  %s2843_s0 = sld [smem:[#allocation16_spill]] }
  0x7b   : > { %s410_s9 = scalar_lea.vmem [#allocation2], %s1740_s14  ;;  %p2556_p11 = pnand %p1989_p9, %p2525_p0 }
  0x7c   : > { %s417_s13 = sshll.u32 %s410_s9, 4  ;;  %s407_s12 = scalar_lea.sflag [#allocation3], %s406_s18  ;;  %s2552_s13 = int_to_ptr.vmem [resolvable:$true] %s417_s13 }
  0x7d   : > { %p2174_p1 = pneg %p2556_p11 }
  0x80   : > { %s2550_s26 = scalar_lea.hbm %s2843_s0, %s1741_s16  ;;  %s2177_s30 = scalar_lea.hbm %s2843_s0, 256 }
  0x81   : > { %s2172_s2 = scalar_lea.hbm %s2550_s26, 128  ;;  %p2178_p13 = scmp.lt.u32.totalorder %s2550_s26, %s2843_s0 }
  0x82   : > { %p2173_p12 = scmp.ne.s32.totalorder %s2550_s26, %s2172_s2  ;;  %p2179_p0 = scmp.lt.u32.totalorder %s2177_s30, %s2172_s2 }
  0x83   : > { %p2181_p5 = scmp.lt.u32.totalorder %s2172_s2, %s2550_s26 }
  0x84   : > { %p2175_p3 = pnand %p2174_p1, %p2173_p12  ;;  %p2180_p2 = por %p2179_p0, %p2178_p13 }
  0x86   : > { %p2176_p8 = pneg %p2175_p3  ;;  %p2182_p7 = por %p2181_p5, %p2180_p2 }
  0x88   : > { %p2183_p9 = pnand %p2182_p7, %p2176_p8 }
  0x8a   : > { %2186 = shalt.err (!%p2183_p9)
}
  0x8b   : > { %s2187_s18 = scalar_lea.vmem %s2552_s13, 128  ;;  %s2284_s9 = smov [#allocation2]  }
  0x8c   : > { %p2188_p12 = scmp.ne.s32.totalorder %s2552_s13, %s2187_s18  ;;  %s2192_s14 = sshll.u32 %s2284_s9, 4  ;;  %s2193_s14 = int_to_ptr.vmem [resolvable:$false] %s2192_s14 }
  0x8d   : > { %s2194_s16 = scalar_lea.vmem %s2193_s14, 256  ;;  %p2195_p4 = scmp.lt.s32.totalorder %s2552_s13, %s2193_s14 }
  0x8e   : > { %p2190_p3 = pnand %p2188_p12, %p2174_p1  ;;  %p2196_p13 = scmp.lt.s32.totalorder %s2194_s16, %s2187_s18 }
  0x90   : > { %p2191_p10 = pneg %p2190_p3  ;;  %p2197_p0 = por %p2196_p13, %p2195_p4 }
  0x92   : > { %p2198_p2 = pnand %p2197_p0, %p2191_p10 }
  0x94   : > { %2201 = shalt.err (!%p2198_p2)
}
  0x95   : > { %1980 = dma.hbm_to_vmem [thread:$0]  (!%p2556_p11), %s2550_s26, 128, %s2552_s13, %s407_s12  }
  0x96   : > { %p2845_p8 = scmp.ne.s32.totalorder %s2834_s28, 0 }
  0x97   : > { %s2588_s2 = sand.u32 (!%p2845_p8), 1, %s2268_s22  }
  0x98   : > { %432 = sbr.rel (%p2845_p8) target bundleno = 3404 (0xd4c), region = 68  ;;  %s1743_s30 = sshll.u32 (!%p2845_p8), %s2588_s2, 3 }
  0x99   : > { %s435_s20 = scalar_lea.sflag (!%p2845_p8), [#allocation3], %s2588_s2  ;;  %s2594_s15 = scalar_lea.vmem (!%p2845_p8), [#allocation2], %s1743_s30 }
  0x9f   : > { %2247 = dma.done.wait (%p2531_p6), %s435_s20, 128  }
  0xa0   : > { %2249 = vsyncadd (%p2531_p6), %s435_s20, 4294967168  ;;  %p2846_p4 = scmp.eq.s32.totalorder %s2381_s27, 0 }
  0xa2   : > { %2251 = dma.done.wait (%p2846_p4), [#allocation6], 1024   ;;  %p2847_p10 = pmov %p2846_p4 }
  0xa3   : > { %p2848_p11 = pmov %p2846_p4 }
  0xa4   : > { %2253 = vsyncadd (%p2847_p10), [#allocation6], 4294966272 }
  0xa5   : > { %2255 = dma.done.wait (%p2848_p11), [#allocation9], 1024   ;;  %p2849_p1 = pmov %p2846_p4 }
  0xa6   : > { %v2285_v0 = vmov 0.0|0.0   ;;  %vm2286_vm0 = vmmov 0   ;;  %v2287_v1 = vmov 0.0   ;;  %vm513_vm1 = vcmask 261120   ;;  %v599_v3 = vld [vmem:[#allocation7] sm:$0xff]  ;;  %v600_v4 = vld [vmem:[#allocation7 + $0x8] sm:$0xff] }
  0xa7   : > { %2257 = vsyncadd (%p2849_p1), [#allocation9], 4294966272  ;;  %1920 = vmatprep.subr.bf16.mxu1 %v2285_v0  ;;  %1912 = vmatprep.subr.bf16.mxu0 %v2285_v0  ;;  %v502_v5 = vld [vmem:[#allocation5] sm:$0xff]  ;;  %v1921_v6 = vpack.c.bf16 %v600_v4, %v599_v3  ;;  %v503_v7 = vld [vmem:[#allocation5 + $0x8] sm:$0xff]  ;;  %vm786_vm3 = vcmask 64512   ;;  %s2288_s10 = smov 120  }
  0xa8   : > { %1847 = vmatprep.mubr.msk.f32.mxu1 %vm2286_vm0, %v2287_v1  ;;  %1836 = vmatprep.mubr.msk.f32.mxu0 %vm2286_vm0, %v2287_v1  ;;  %vm2616_vm2 = vmpackc.low %vm513_vm1, %vm513_vm1  ;;  %v1913_v8 = vpack.c.bf16 %v503_v7, %v502_v5  ;;  %v601_v9 = vld [vmem:[#allocation7 + $0x10] sm:$0xff]  ;;  %v602_v10 = vld [vmem:[#allocation7 + $0x18] sm:$0xff]  ;;  %p498_p6 = scmp.lt.s32.totalorder %s2381_s27, 1  ;;  %s2290_s28 = smov 104   ;;  %vm1470_vm4 = vcmask 130048   ;;  %vm1472_vm5 = vcmask 195584  }
  0xa9   : > { %1923 = vmatpush3.bf16.xpose.msk.msra.mxu1 %vm2616_vm2, %v1921_v6  ;;  %v504_v11 = vld [vmem:[#allocation5 + $0x10] sm:$0xff]  ;;  %v505_v12 = vld [vmem:[#allocation5 + $0x18] sm:$0xff]  ;;  %v1925_v13 = vpack.c.bf16 %v602_v10, %v601_v9  ;;  %v692_v24 = vld [vmem:[#allocation8] sm:$0xff]  ;;  %s2291_s17 = smov 8   ;;  %s2292_s26 = smov 16  }
  0xaa   : > { %1915 = vmatpush3.bf16.xpose.msk.msra.mxu0 %vm2616_vm2, %v1913_v8  ;;  %1924 = vmatprep.subr.bf16.mxu1 %v2285_v0  ;;  %v1917_v14 = vpack.c.bf16 %v505_v12, %v504_v11  ;;  %v2633_v15 = vld [vmem:[%s2594_s15] sm:$0xff]  ;;  %v693_v25 = vld [vmem:[#allocation8 + $0x8] sm:$0xff]  ;;  %s499_s12 = scalar_select %p498_p6, %s2381_s27, 1 }
  0xab   : > { %1916 = vmatprep.subr.bf16.mxu0 %v2285_v0  ;;  %v1755_v16 = vld [vmem:[%s2816_s5] ss:$0 sm:$0xff]  ;;  %v1929_v26 = vpack.c.bf16 %v693_v25, %v692_v24  ;;  %v695_v28 = vld [vmem:[#allocation8 + $0x18] sm:$0xff]  ;;  %s2289_s15 = smov 112   ;;  %s2293_s13 = smov 24  }
  0xac   : > { %v1749_v17 = vld [vmem:[%s2814_s3] ss:$0 sm:$0xff]  ;;  %s500_s14 = scalar_lea.vmem %s2812_s1, %s499_s12  ;;  %s2852_s18 = sld [smem:[#allocation18_spill]] }
  0xad   : > { %v694_v27 = vld [vmem:[#allocation8 + $0x10] sm:$0xff]  ;;  %s2853_s16 = sld [smem:[#allocation19_spill]]  ;;  %s1603_s9 = scalar_lea.sflag [#allocation4], %s2588_s2 }
  0xae   : > { %v1933_v29 = vpack.c.bf16 %v695_v28, %v694_v27  ;;  %v2679_v31 = vld [vmem:[%s500_s14] ss:$0 sm:$0xff]  ;;  %p2856_p7 = scmp.ne.s32.totalorder %s2841_s11, 0 }
  0xaf   : > { %v1761_v41 = vld [vmem:[%s2818_s7] ss:$0 sm:$0xff] }
  0xb1   : > { %1927 = vmatpush3.bf16.xpose.msk.msra.mxu1 %vm2616_vm2, %v1925_v13 }
  0xb2   : > { %1919 = vmatpush3.bf16.xpose.msk.msra.mxu0 %vm2616_vm2, %v1917_v14  ;;  %1861 = vmatprep.subr.mxu1 %v2287_v1  ;;  %v1780_v2 = vld [vmem:[%s2852_s18] ss:$0 sm:$0xff]  ;;  %s2855_s18 = sld [smem:[#allocation21_spill]] }
  0xb3   : > { %1928 = vmatprep.subr.bf16.mxu0 %v2285_v0 }
  0xb8   : > { %1848 = vmatmul.mubr.msk.f32.vlgmr.msra.gmra.mrb[0].mxu1 %vm513_vm1, %v2633_v15 }
  0xb9   : > { %1837 = vmatmul.mubr.msk.f32.vlgmr.msra.gmra.mrb[0].mxu0 %vm513_vm1, %v2633_v15  ;;  %1863 = vmatprep.mubr.msk.f32.mxu1 %vm2286_vm0, %v2287_v1 }
  0xba   : > { %1858 = vmatprep.mubr.msk.f32.mxu0 %vm2286_vm0, %v2287_v1  ;;  %1931 = vmatpush3.bf16.xpose.msk.msra.mxu0 %vm2616_vm2, %v1929_v26 }
  0xbb   : > { %1932 = vmatprep.subr.bf16.mxu0 %v2285_v0 }
  0xc2   : > { %1935 = vmatpush3.bf16.xpose.msk.msra.mxu0 %vm2616_vm2, %v1933_v29 }
  0xc3   : > { %1936 = vmatprep.subr.bf16.mxu0 %v2285_v0 }
  0xc9   : > { %1859 = vmatmul.mubr.msk.f32.vlgmr.msra.gmra.mrb[2].mxu0 %vm513_vm1, %v2633_v15 }
  0xca   : > { %1909 = vmatprep.mubr.msk.f32.mxu0 %vm2286_vm0, %v2287_v1 }
 0x18b   : > { %v688_v18 = vpop.f32.mrb[0].mxu1 }
 0x18c   : > { %v2649_v19 = vadd.f32 %v1755_v16, %v688_v18  ;;  %v1849_v20 = vpop.f32.mrb[1].mxu1  ;;  %v595_v21 = vpop.f32.mrb[0].mxu0 }
 0x18d   : > { %v2651_v22 = vadd.f32 %v1749_v17, %v595_v21  ;;  %v1838_v23 = vpop.f32.mrb[1].mxu0 }
 0x18e   : > { %957 = vrot.lane.b32.xlu1 %v2649_v19, %s2288_s10  ;;  %1862 = vmatpush3.xpose.msk.msra.mxu1 %vm786_vm3, %v2649_v19 }
 0x18f   : > { %1866 = vmatprep.subr.mxu1 %v2287_v1 }
 0x191   : > { %1864 = vmatmul.mubr.msk.f32.vlgmr.msra.gmra.mrb[2].mxu1 %vm786_vm3, %v2651_v22 }
 0x192   : > { %955 = vrot.lane.b32.xlu1 %v2651_v22, %s2288_s10  ;;  %1868 = vmatprep.mubr.msk.f32.mxu1 %vm2286_vm0, %v2287_v1 }
 0x19c   : > { %v781_v42 = vpop.f32.mrb[2].mxu0 }
 0x19d   : > { %v2687_v43 = vadd.f32 %v1761_v41, %v781_v42  ;;  %v1860_v44 = vpop.f32.mrb[3].mxu0  ;;  %v1474_v41 = vld [vmem:[#allocation10] sm:$0xff]  ;;  %v1475_v42 = vld [vmem:[#allocation10 + $0x8] sm:$0xff] }
 0x19e   : > { %v1476_v44 = vld [vmem:[#allocation10 + $0x10] sm:$0xff] }
 0x19f   : > { %1867 = vmatpush3.msra.mxu1 %v2687_v43 }
 0x1a0   : > { %1871 = vmatprep.subr.mxu1 %v2287_v1 }
 0x200   : > { %v958_v47 = vpop.permute.xlu1 %957 }
 0x204   : > { %v956_v49 = vpop.permute.xlu1 %955 }
 0x264   : > { %v859_v30 = vpop.f32.mrb[2].mxu1 }
 0x265   : > { %v863_v32 = vmul.f32 0.35355338, %v859_v30  ;;  %v1865_v33 = vpop.f32.mrb[3].mxu1 }
 0x267   : > { %v870_v34 = vadd.f32 %v2679_v31, %v863_v32 }
 0x269   : > { %v871_v35 = vsel %vm786_vm3, %v870_v34, -inf }
 0x26a   : > { %872 = vmax.xlane.f32.xlu0 %v871_v35 }
 0x2f7   : > { %v873_v36 = vpop.xlane.xlu0 %872 }
 0x2f8   : > { %v874_v37 = vsub.f32 %v870_v34, %v873_v36 }
 0x2fa   : > { %v875_v38 = vmul.f32 1.442695, %v874_v37 }
 0x2fc   : > { %2042 = vpow2.f32 %v875_v38 }
 0x306   : > { %v2043_v39 = vpop.eup %2042 }
 0x307   : > { %v877_v40 = vsel %vm786_vm3, %v2043_v39, 0.0 }
 0x308   : > { %878 = vadd.xlane.f32.xlu0 %v877_v40 }
 0x395   : > { %v879_v45 = vpop.xlane.xlu0 %878 }
 0x396   : > { %2044 = vrcp.f32 %v879_v45  ;;  %v1477_v45 = vld [vmem:[#allocation10 + $0x18] sm:$0xff] }
 0x3a0   : > { %v2045_v46 = vpop.eup %2044 }
 0x3a1   : > { %v881_v48 = vmul.f32 %v2045_v46, %v2043_v39  ;;  %v1941_v46 = vpack.c.bf16 %v1477_v45, %v1476_v44 }
 0x3a3   : > { %1869 = vmatmul.mubr.msk.f32.vlgmr.msra.gmra.mrb[4].mxu1 %vm786_vm3, %v881_v48 }
 0x3a4   : > { %1872 = vmatpush3.xpose.msk.msra.mxu1 %vm786_vm3, %v958_v47  ;;  %1873 = vmatprep.mubr.msk.f32.mxu1 %vm2286_vm0, %v2287_v1 }
 0x3a5   : > { %1876 = vmatprep.subr.mxu1 %v2287_v1 }
 0x3a7   : > { %1874 = vmatmul.mubr.msk.f32.vlgmr.msra.gmra.mrb[6].mxu1 %vm786_vm3, %v956_v49 }
 0x3a8   : > { %1878 = vmatprep.mubr.msk.f32.mxu1 %vm2286_vm0, %v2287_v1 }
 0x476   : > { %v2699_v50 = vpop.f32.mrb[4].mxu1 }
 0x477   : > { %v1870_v51 = vpop.f32.mrb[5].mxu1 }
 0x47a   : > { %v1029_v52 = vpop.f32.mrb[6].mxu1 }
 0x47b   : > { %v1033_v53 = vmul.f32 0.35355338, %v1029_v52  ;;  %v1875_v54 = vpop.f32.mrb[7].mxu1 }
 0x47d   : > { %v1034_v55 = vadd.f32 %v2679_v31, %v1033_v53 }
 0x47f   : > { %v1035_v56 = vsel %vm786_vm3, %v1034_v55, -inf }
 0x480   : > { %1036 = vmax.xlane.f32.xlu0 %v1035_v56 }
 0x496   : > { %1047 = vrot.lane.b32.xlu0 %v2687_v43, %s2288_s10 }
 0x49a   : > { %1125 = vrot.lane.b32.xlu0 %v2649_v19, %s2289_s15 }
 0x49e   : > { %1123 = vrot.lane.b32.xlu0 %v2651_v22, %s2289_s15 }
 0x50d   : > { %v1037_v57 = vpop.xlane.xlu0 %1036 }
 0x50e   : > { %v1038_v58 = vsub.f32 %v1034_v55, %v1037_v57 }
 0x510   : > { %v1039_v59 = vmul.f32 1.442695, %v1038_v58 }
 0x511   : > { %v1048_v60 = vpop.permute.xlu0 %1047 }
 0x512   : > { %2046 = vpow2.f32 %v1039_v59  ;;  %1877 = vmatpush3.msra.mxu1 %v1048_v60 }
 0x513   : > { %1881 = vmatprep.subr.mxu1 %v2287_v1 }
 0x515   : > { %v1126_v4 = vpop.permute.xlu0 %1125 }
 0x519   : > { %v1124_v6 = vpop.permute.xlu0 %1123 }
 0x51c   : > { %v2047_v61 = vpop.eup %2046 }
 0x51d   : > { %v1041_v62 = vsel %vm786_vm3, %v2047_v61, 0.0 }
 0x51e   : > { %1042 = vadd.xlane.f32.xlu1 %v1041_v62 }
 0x52f   : > { %1214 = vrot.lane.b32.xlu1 %v2687_v43, %s2289_s15 }
 0x533   : > { %1292 = vrot.lane.b32.xlu1 %v2649_v19, %s2290_s28 }
 0x5ab   : > { %v1043_v63 = vpop.xlane.xlu1 %1042 }
 0x5ac   : > { %2048 = vrcp.f32 %v1043_v63 }
 0x5af   : > { %v1215_v7 = vpop.permute.xlu1 %1214 }
 0x5b3   : > { %v1293_v21 = vpop.permute.xlu1 %1292 }
 0x5b6   : > { %v2049_v3 = vpop.eup %2048 }
 0x5b7   : > { %v1045_v5 = vmul.f32 %v2049_v3, %v2047_v61 }
 0x5b9   : > { %1879 = vmatmul.mubr.msk.f32.vlgmr.msra.gmra.mrb[8].mxu1 %vm786_vm3, %v1045_v5 }
 0x5ba   : > { %1882 = vmatpush3.xpose.msk.msra.mxu1 %vm786_vm3, %v1126_v4  ;;  %1883 = vmatprep.mubr.msk.f32.mxu1 %vm2286_vm0, %v2287_v1 }
 0x5bb   : > { %1886 = vmatprep.subr.mxu1 %v2287_v1 }
 0x5bd   : > { %1884 = vmatmul.mubr.msk.f32.vlgmr.msra.gmra.mrb[10].mxu1 %vm786_vm3, %v1124_v6 }
 0x5be   : > { %1887 = vmatpush3.msra.mxu1 %v1215_v7  ;;  %1888 = vmatprep.mubr.msk.f32.mxu1 %vm2286_vm0, %v2287_v1 }
 0x5bf   : > { %1891 = vmatprep.subr.mxu1 %v2287_v1 }
 0x68c   : > { %v1119_v8 = vpop.f32.mrb[8].mxu1 }
 0x68d   : > { %v1880_v9 = vpop.f32.mrb[9].mxu1 }
 0x690   : > { %v1197_v10 = vpop.f32.mrb[10].mxu1 }
 0x691   : > { %v1201_v11 = vmul.f32 0.35355338, %v1197_v10  ;;  %v1885_v12 = vpop.f32.mrb[11].mxu1 }
 0x693   : > { %v1202_v13 = vadd.f32 %v2679_v31, %v1201_v11 }
 0x695   : > { %v1203_v14 = vsel %vm786_vm3, %v1202_v13, -inf }
 0x696   : > { %1204 = vmax.xlane.f32.xlu0 %v1203_v14 }
 0x723   : > { %v1205_v16 = vpop.xlane.xlu0 %1204 }
 0x724   : > { %v1206_v17 = vsub.f32 %v1202_v13, %v1205_v16 }
 0x726   : > { %v1207_v18 = vmul.f32 1.442695, %v1206_v17 }
 0x728   : > { %2050 = vpow2.f32 %v1207_v18 }
 0x732   : > { %v2051_v19 = vpop.eup %2050 }
 0x733   : > { %v1209_v20 = vsel %vm786_vm3, %v2051_v19, 0.0 }
 0x734   : > { %1210 = vadd.xlane.f32.xlu1 %v1209_v20 }
 0x745   : > { %1290 = vrot.lane.b32.xlu1 %v2651_v22, %s2290_s28 }
 0x7c1   : > { %v1211_v23 = vpop.xlane.xlu1 %1210 }
 0x7c2   : > { %2052 = vrcp.f32 %v1211_v23 }
 0x7c5   : > { %v1291_v26 = vpop.permute.xlu1 %1290 }
 0x7cc   : > { %v2053_v24 = vpop.eup %2052 }
 0x7cd   : > { %v1213_v25 = vmul.f32 %v2053_v24, %v2051_v19 }
 0x7cf   : > { %1889 = vmatmul.mubr.msk.f32.vlgmr.msra.gmra.mrb[12].mxu1 %vm786_vm3, %v1213_v25 }
 0x7d0   : > { %1892 = vmatpush3.xpose.msk.msra.mxu1 %vm786_vm3, %v1293_v21  ;;  %1893 = vmatprep.mubr.msk.f32.mxu1 %vm2286_vm0, %v2287_v1 }
 0x7d1   : > { %1896 = vmatprep.subr.mxu1 %v2287_v1 }
 0x7d3   : > { %1894 = vmatmul.mubr.msk.f32.vlgmr.msra.gmra.mrb[14].mxu1 %vm786_vm3, %v1291_v26 }
 0x7d4   : > { %1898 = vmatprep.mubr.msk.f32.mxu1 %vm2286_vm0, %v2287_v1 }
 0x8a2   : > { %v1286_v22 = vpop.f32.mrb[12].mxu1 }
 0x8a3   : > { %v1890_v27 = vpop.f32.mrb[13].mxu1 }
 0x8a6   : > { %v1364_v28 = vpop.f32.mrb[14].mxu1 }
 0x8a7   : > { %v1368_v29 = vmul.f32 0.35355338, %v1364_v28  ;;  %v1895_v30 = vpop.f32.mrb[15].mxu1 }
 0x8a9   : > { %v1369_v32 = vadd.f32 %v2679_v31, %v1368_v29 }
 0x8ab   : > { %v1370_v33 = vsel %vm786_vm3, %v1369_v32, -inf }
 0x8ac   : > { %1371 = vmax.xlane.f32.xlu0 %v1370_v33 }
 0x8c2   : > { %1381 = vrot.lane.b32.xlu0 %v2687_v43, %s2290_s28  ;;  %v1937_v43 = vpack.c.bf16 %v1475_v42, %v1474_v41  ;;  %s2854_s28 = sld [smem:[#allocation20_spill]] }
 0x8c4   : > { %1939 = vmatpush3.bf16.xpose.msk.msra.mxu0 %vm2616_vm2, %v1937_v43 }
 0x8c5   : > { %1940 = vmatprep.subr.bf16.mxu0 %v2285_v0 }
 0x8c6   : > { %1458 = vrot.lane.b32.xlu0 %v1119_v8, %s2291_s17  ;;  %s1789_s17 = sshll.u32 %s2381_s27, 7  ;;  %s2294_s27 = smov [#allocation11]  }
 0x8c7   : > { %s2766_s0 = scalar_lea.hbm %s2855_s18, %s1789_s17 }
 0x8c8   : > { %v1787_v8 = vld [vmem:[%s2854_s28] ss:$0 sm:$0xff] }
 0x8ca   : > { %1462 = vrot.lane.b32.xlu0 %v1286_v22, %s2292_s26  ;;  %s497_s26 = scalar_lea.vmem [#allocation11], %s1743_s30  ;;  %s2206_s30 = sshll.u32 %s2294_s27, 4  ;;  %s2207_s30 = int_to_ptr.vmem [resolvable:$false] %s2206_s30 }
 0x8cc   : > { %1943 = vmatpush3.bf16.xpose.msk.msra.mxu0 %vm2616_vm2, %v1941_v46 }
 0x939   : > { %v1372_v34 = vpop.xlane.xlu0 %1371 }
 0x93a   : > { %v1373_v35 = vsub.f32 %v1369_v32, %v1372_v34 }
 0x93c   : > { %v1374_v1 = vmul.f32 1.442695, %v1373_v35 }
 0x93d   : > { %v1382_v36 = vpop.permute.xlu0 %1381 }
 0x93e   : > { %2054 = vpow2.f32 %v1374_v1  ;;  %1897 = vmatpush3.msra.mxu1 %v1382_v36 }
 0x941   : > { %v1459_v49 = vpop.permute.xlu0 %1458 }
 0x942   : > { %v1469_v52 = vsel %vm786_vm3, %v2699_v50, %v1459_v49 }
 0x945   : > { %v1463_v51 = vpop.permute.xlu0 %1462 }
 0x946   : > { %v1471_v53 = vsel %vm1470_vm4, %v1469_v52, %v1463_v51 }
 0x948   : > { %v2055_v37 = vpop.eup %2054 }
 0x949   : > { %v1376_v38 = vsel %vm786_vm3, %v2055_v37, 0.0 }
 0x94a   : > { %1377 = vadd.xlane.f32.xlu1 %v1376_v38 }
 0x9d7   : > { %v1378_v31 = vpop.xlane.xlu1 %1377 }
 0x9d8   : > { %2056 = vrcp.f32 %v1378_v31 }
 0x9e2   : > { %v2057_v39 = vpop.eup %2056 }
 0x9e3   : > { %v1380_v40 = vmul.f32 %v2057_v39, %v2055_v37 }
 0x9e5   : > { %1899 = vmatmul.mubr.msk.f32.vlgmr.msra.gmra.mrb[16].mxu1 %vm786_vm3, %v1380_v40 }
 0xab8   : > { %v1453_v47 = vpop.f32.mrb[16].mxu1 }
 0xab9   : > { %1466 = vrot.lane.b32.xlu0 %v1453_v47, %s2293_s13  ;;  %v1900_v48 = vpop.f32.mrb[17].mxu1  ;;  %s1616_s13 = sshll.u32 %s497_s26, 4  ;;  %s2768_s13 = int_to_ptr.vmem [resolvable:$true] %s1616_s13 }
 0xaba   : > { %s2202_s14 = scalar_lea.vmem %s2768_s13, 128  ;;  %p2209_p3 = scmp.lt.s32.totalorder %s2768_s13, %s2207_s30 }
 0xabb   : > { %p2203_p5 = scmp.ne.s32.totalorder %s2768_s13, %s2202_s14 }
 0xabd   : > { %p2204_p9 = pnand %p2203_p5, %p2856_p7 }
 0xabf   : > { %p2205_p12 = pneg %p2204_p9 }
 0xb2b   : > { %v1467_v54 = vpop.permute.xlu0 %1466 }
 0xb2c   : > { %v1473_v0 = vsel %vm1472_vm5, %v1471_v53, %v1467_v54 }
 0xb2d   : > { %1910 = vmatmul.mubr.msk.f32.vlgmr.msra.gmra.mrb[4].mxu0 %vm513_vm1, %v1473_v0 }
 0xc00   : > { %v1566_v55 = vpop.f32.mrb[4].mxu0 }
 0xc01   : > { %v1567_v56 = vadd.f32 %v1780_v2, %v1566_v55  ;;  %v1911_v57 = vpop.f32.mrb[5].mxu0 }
 0xc03   : > { %v1570_v58 = vadd.f32 %v1567_v56, %v2633_v15  ;;  %v1786_v15 = vld [vmem:[%s2853_s16] ss:$0 sm:$0xff]  ;;  %s2208_s16 = scalar_lea.vmem %s2207_s30, 256 }
 0xc04   : > { %p2210_p13 = scmp.lt.s32.totalorder %s2208_s16, %s2202_s14 }
 0xc05   : > { %v1573_v59 = vsel %vm513_vm1, %v1570_v58, 0.0 }
 0xc06   : > { %1574 = vadd.xlane.f32.xlu1 %v1573_v59  ;;  %p2211_p0 = por %p2210_p13, %p2209_p3 }
 0xc08   : > { %p2212_p2 = pnand %p2211_p0, %p2205_p12 }
 0xc93   : > { %v1575_v50 = vpop.xlane.xlu1 %1574 }
 0xc94   : > { %v1577_v60 = vmul.f32 0.03125, %v1575_v50 }
 0xc96   : > { %v1578_v61 = vsub.f32 %v1570_v58, %v1577_v60 }
 0xc98   : > { %v1579_v62 = vmul.f32 %v1578_v61, %v1578_v61 }
 0xc9a   : > { %v1580_v63 = vsel %vm513_vm1, %v1579_v62, 0.0 }
 0xc9b   : > { %1581 = vadd.xlane.f32.xlu0 %v1580_v63 }
 0xd28   : > { %v1582_v3 = vpop.xlane.xlu0 %1581 }
 0xd29   : > { %v1583_v4 = vmul.f32 0.03125, %v1582_v3 }
 0xd2b   : > { %v1584_v5 = vadd.f32 1e-12, %v1583_v4 }
 0xd2d   : > { %2058 = vrsqrt.f32 %v1584_v5 }
 0xd37   : > { %v2059_v6 = vpop.eup %2058 }
 0xd38   : > { %v1586_v7 = vmul.f32 %v2059_v6, %v1578_v61 }
 0xd3a   : > { %v1593_v9 = vmul.f32 %v1786_v15, %v1586_v7 }
 0xd3c   : > { %v1600_v10 = vadd.f32 %v1787_v8, %v1593_v9 }
 0xd3e   : > { %1601 = vst.msk [vmem:[%s497_s26] sm:$0xff] %vm513_vm1, %v1600_v10 }
 0xd3f   : > { %2215 = shalt.err (!%p2212_p2)
}
 0xd40   : > { %s2216_s2 = scalar_lea.hbm %s2766_s0, 128  ;;  %s2220_s28 = scalar_lea.hbm %s2855_s18, 256 }
 0xd41   : > { %p2217_p8 = scmp.ne.s32.totalorder %s2766_s0, %s2216_s2  ;;  %p2221_p11 = scmp.lt.u32.totalorder %s2766_s0, %s2855_s18 }
 0xd42   : > { %p2222_p1 = scmp.lt.u32.totalorder %s2220_s28, %s2216_s2  ;;  %p2224_p5 = scmp.lt.u32.totalorder %s2216_s2, %s2766_s0 }
 0xd43   : > { %p2218_p4 = pnand %p2217_p8, %p2856_p7 }
 0xd44   : > { %p2223_p6 = por %p2222_p1, %p2221_p11 }
 0xd45   : > { %p2219_p10 = pneg %p2218_p4 }
 0xd46   : > { %p2225_p9 = por %p2224_p5, %p2223_p6 }
 0xd48   : > { %p2226_p12 = pnand %p2225_p9, %p2219_p10 }
 0xd4a   : > { %2229 = shalt.err (!%p2226_p12)
}
 0xd4b   : > { %1962 = dma.vmem_to_hbm [thread:$0]  (%p2856_p7), %s2768_s13, 128, %s2766_s0, %s1603_s9  }
 0xd4c PF: > { %s1628_s10 = sand.u32 1, %s2264_s21   ;;  %p2857_p3 = scmp.ne.s32.totalorder %s2842_s29, 0 }
 0xd4d   : > { %p2858_p13 = scmp.ge.s32.totalorder %s2276_s24, 2  ;;  %s1629_s12 = scalar_lea.sflag [#allocation4], %s1628_s10 }
 0xd4f   : > { %p1982_p0 = pnand %p2858_p13, %p2857_p3 }
 0xd51   : > { %2259 = dma.done.wait (!%p1982_p0), %s1629_s12, 128  }
 0xd52   : > { %2261 = vsyncadd (!%p1982_p0), %s1629_s12, 4294967168  ;;  %p27_p2 = scmp.ge.s32.totalorder %s2512_s25, 4   ;;  %s2859_s21 = smov %s2268_s22 }
 0xd53   : > { %s2860_s22 = smov %s2272_s23  ;;  %s2861_s23 = smov %s2523_s19 }
 0xd54   : > { %s2862_s24 = smov %s2512_s25  ;;  %29 = sbr.rel (!%p27_p2) target bundleno = 14 (0xe), region = 132 }
 0xd5b   :  { %1634 = vsyncpa [#allocation3], 1 }
 0xd5c   :  { %1636 = vsyncpa [#allocation3 + $0x1], 1 }
 0xd5d   :  { %1637 = vsyncpa [#allocation6], 1 }
 0xd5e   :  { %1638 = vsyncpa [#allocation9], 1 }
 0xd5f   :  { %1639 = vsyncpa [#allocation4], 1 }
 0xd60   :  { %1641 = vsyncpa [#allocation4 + $0x1], 1 }

</bundles_post_ra>
